<compile_context>
chip_gen: v6e
topology: v6e:2x2x1
jax: 0.10.0
libtpu: 0.0.40
codegen_flags: <defaults>
</compile_context>

<pallas_src>
import functools

import jax
import jax.numpy as jnp
from jax import lax
from jax.experimental import pallas as pl
from jax.experimental.pallas import tpu as pltpu


# ---------------------------------------------------------------------------
# Chip-aware VMEM budgets
# ---------------------------------------------------------------------------
def _budgets():
    try:
        cap = getattr(pltpu.get_tpu_info(), "vmem_capacity_bytes", 128 * 1024 * 1024)
    except Exception:  # interpret mode / unknown chip
        cap = 128 * 1024 * 1024
    if cap <= 64 * 1024 * 1024:              # v7x-like: 64 MiB per TensorCore
        return 40 * 1024 * 1024, 12 * 1024 * 1024
    return 96 * 1024 * 1024, 24 * 1024 * 1024  # v5e / v6e: 128 MiB


_VMEM_LIMIT, _BLOCK_BUDGET = _budgets()
_ROW_TILE_CANDIDATES = (2048, 1024, 512, 256, 128, 64, 32, 16, 8)


def _round_up(x, m):
    return (x + m - 1) // m * m


def _pick_row_tile(rows, per_row_bytes, fixed_bytes, *, min_steps=8, row_align=8):
    """Largest row tile (multiple of row_align) such that the double-buffered
    row-dependent blocks plus the resident (double-buffered) weight/bias/KV blocks
    stay within the per-step VMEM budget, while keeping the grid >= min_steps long."""
    rows_a = _round_up(rows, row_align)
    budget = max(_BLOCK_BUDGET - fixed_bytes, 2 * row_align * per_row_bytes)
    tmax = max(budget // (2 * per_row_bytes), row_align)
    tmax = min(tmax, rows_a)
    if rows_a >= row_align * min_steps:      # keep grid long enough (v7x: 2 TCs + pipeline)
        tmax = min(tmax, max(rows_a // min_steps, row_align))
    for t in _ROW_TILE_CANDIDATES:
        if t <= tmax and t % row_align == 0:
            return t
    return row_align


def _row_align(dtype):
    return 16 if jnp.dtype(dtype).itemsize == 2 else 8


# ---------------------------------------------------------------------------
# Linear:  Y = X @ W^T + b   (row tiled, optional fused LayerNorm epilogue)
# ---------------------------------------------------------------------------
def _linear_kernel(x_ref, w_ref, b_ref, o_ref):
    acc = jnp.dot(x_ref[...], w_ref[...], preferred_element_type=jnp.float32)
    acc = acc + b_ref[...].astype(jnp.float32)
    o_ref[...] = acc.astype(o_ref.dtype)


def _linear_ln_kernel(x_ref, w_ref, b_ref, g_ref, beta_ref, o_ref, *, eps):
    acc = jnp.dot(x_ref[...], w_ref[...], preferred_element_type=jnp.float32)
    acc = acc + b_ref[...].astype(jnp.float32)
    mu = jnp.mean(acc, axis=-1, keepdims=True)
    ms = jnp.mean(acc * acc, axis=-1, keepdims=True)
    var = jnp.maximum(ms - mu * mu, 0.0)                    # biased var (matches F.layer_norm)
    inv = lax.rsqrt(var + eps)
    y = (acc - mu) * inv * g_ref[...].astype(jnp.float32) + beta_ref[...].astype(jnp.float32)
    o_ref[...] = y.astype(o_ref.dtype)


def linear(x, weight, bias=None, *, ln_params=None, out_dtype=None):
    """x: (M, K); weight: (N_out, K) (PyTorch nn.Linear layout); bias: (N_out,) or None.
    ln_params = (gamma, beta, eps) fuses LayerNorm over the output dim into the epilogue."""
    M, K = x.shape
    n_out = weight.shape[0]
    out_dtype = out_dtype or x.dtype
    itemsize = jnp.dtype(x.dtype).itemsize
    align = _row_align(x.dtype)

    wt = jnp.asarray(weight).astype(x.dtype).T                       # (K, N_out)
    b = jnp.zeros((n_out,), x.dtype) if bias is None else jnp.asarray(bias)
    b2 = b.reshape(1, n_out).astype(x.dtype)

    # budget: row-dependent blocks (in + out, double buffered, + f32 accumulator)
    # and resident (double-buffered) weight + bias blocks
    per_row = (K + n_out) * itemsize + 4 * n_out
    fixed = 2 * (K * n_out + n_out) * itemsize
    TM = _pick_row_tile(M, per_row, fixed, row_align=align)
    Mp = _round_up(M, TM)
    xp = jnp.pad(x, ((0, Mp - M), (0, 0))) if Mp != M else x

    if ln_params is None:
        kernel = _linear_kernel
        extra_in, extra_specs = [], []
    else:
        gamma, beta, eps = ln_params
        kernel = functools.partial(_linear_ln_kernel, eps=eps)
        extra_in = [jnp.asarray(gamma).reshape(1, n_out),
                    jnp.asarray(beta).reshape(1, n_out)]
        extra_specs = [pl.BlockSpec((1, n_out), lambda i: (0, 0)),
                       pl.BlockSpec((1, n_out), lambda i: (0, 0))]

    out = pl.pallas_call(
        kernel,
        out_shape=jax.ShapeDtypeStruct((Mp, n_out), out_dtype),
        grid_spec=pltpu.PrefetchScalarGridSpec(
            num_scalar_prefetch=0,
            grid=(Mp // TM,),
            in_specs=[
                pl.BlockSpec((TM, K), lambda i: (i, 0)),
                pl.BlockSpec((K, n_out), lambda i: (0, 0)),
                pl.BlockSpec((1, n_out), lambda i: (0, 0)),
            ] + extra_specs,
            out_specs=pl.BlockSpec((TM, n_out), lambda i: (i, 0)),
        ),
        compiler_params=pltpu.CompilerParams(
            dimension_semantics=("parallel",),
            vmem_limit_bytes=_VMEM_LIMIT),
    )(xp, wt, b2, *extra_in)
    return out[:M] if Mp != M else out


# ---------------------------------------------------------------------------
# Fused attention: Q-proj + per-head softmax(QK^T*scale)@V + output projection
#   x block  : (TQ, C)    lane-dense query source rows
#   kv block : (Nkv, 2C)  K = cols [0, C), V = cols [C, 2C)
#   out block: (TQ, C)    lane-dense (all heads written together)
# ---------------------------------------------------------------------------
def _attn_kernel(x_ref, kv_ref, qw_ref, qb_ref, pw_ref, pb_ref, o_ref, *,
                 num_heads, scale):
    C = x_ref.shape[-1]
    hd = C // num_heads
    cdt = x_ref.dtype                                      # MXU operand dtype

    # fused Q projection: contraction depth = C (good MXU utilisation)
    q = jnp.dot(x_ref[...], qw_ref[...], preferred_element_type=jnp.float32)
    q = (q + qb_ref[...].astype(jnp.float32)) * scale
    q = q.astype(cdt)

    kv = kv_ref[...]
    outs = []
    for h in range(num_heads):                             # static unroll over heads
        q_h = q[:, h * hd:(h + 1) * hd]
        k_h = kv[:, h * hd:(h + 1) * hd]
        v_h = kv[:, C + h * hd:C + (h + 1) * hd]
        # (TQ, hd) x (Nkv, hd) contracted on hd -> (TQ, Nkv), f32 accumulation
        s = lax.dot_general(q_h, k_h, (((1,), (1,)), ((), ())),
                            preferred_element_type=jnp.float32)
        m = jnp.max(s, axis=-1, keepdims=True)
        p = jnp.exp(s - m)
        l = jnp.sum(p, axis=-1, keepdims=True)
        o_h = jnp.dot(p.astype(cdt), v_h, preferred_element_type=jnp.float32)
        # one EUP reciprocal per row instead of a VPU divide over (TQ, Nkv)
        o_h = o_h * pl.reciprocal(l, approx=True)
        outs.append(o_h)
    o = jnp.concatenate(outs, axis=-1)                     # (TQ, C), f32

    # fused output projection + bias
    y = jnp.dot(o.astype(cdt), pw_ref[...], preferred_element_type=jnp.float32)
    y = y + pb_ref[...].astype(jnp.float32)
    o_ref[...] = y.astype(o_ref.dtype)


def attention_proj(x_bnc, kv_bn2c, q_w, q_b, proj_w, proj_b, *,
                   num_heads, scale, out_dtype=None):
    """x_bnc: (B, N, C); kv_bn2c: (B, Nkv, 2C)  ->  (B, N, C) (already projected)."""
    B, N, C = x_bnc.shape
    Nkv = kv_bn2c.shape[1]
    dt = x_bnc.dtype
    out_dtype = out_dtype or dt
    itemsize = jnp.dtype(dt).itemsize
    align = _row_align(dt)

    qw_t = jnp.asarray(q_w).astype(dt).T                   # (C_in, C_out)
    pw_t = jnp.asarray(proj_w).astype(dt).T
    qb = jnp.zeros((C,), dt) if q_b is None else jnp.asarray(q_b)
    qb2 = qb.reshape(1, C).astype(dt)
    pb2 = jnp.asarray(proj_b).reshape(1, C).astype(dt)

    # resident (double-buffered) blocks: kv + both weights + biases
    fixed = 2 * (Nkv * 2 * C + 2 * C * C + 2 * C) * itemsize
    # per query row: x + out blocks (double buffered) + f32 working set (q, scores, o)
    per_row = 2 * 2 * C * itemsize + 4 * (2 * C + Nkv + C)
    TQ = min(_pick_row_tile(N, per_row, fixed, min_steps=4, row_align=align), 512)
    Np = _round_up(N, TQ)
    xp = jnp.pad(x_bnc, ((0, 0), (0, Np - N), (0, 0))) if Np != N else x_bnc

    out = pl.pallas_call(
        functools.partial(_attn_kernel, num_heads=num_heads, scale=scale),
        out_shape=jax.ShapeDtypeStruct((B, Np, C), out_dtype),
        grid_spec=pltpu.PrefetchScalarGridSpec(
            num_scalar_prefetch=0,
            grid=(B, Np // TQ),
            in_specs=[
                pl.BlockSpec((None, TQ, C), lambda b, i: (b, i, 0)),       # x rows
                pl.BlockSpec((None, Nkv, 2 * C), lambda b, i: (b, 0, 0)),  # kv (whole)
                pl.BlockSpec((C, C), lambda b, i: (0, 0)),                 # q weight
                pl.BlockSpec((1, C), lambda b, i: (0, 0)),                 # q bias
                pl.BlockSpec((C, C), lambda b, i: (0, 0)),                 # proj weight
                pl.BlockSpec((1, C), lambda b, i: (0, 0)),                 # proj bias
            ],
            out_specs=pl.BlockSpec((None, TQ, C), lambda b, i: (b, i, 0)),
        ),
        compiler_params=pltpu.CompilerParams(
            dimension_semantics=("parallel", "parallel"),
            vmem_limit_bytes=_VMEM_LIMIT),
    )(xp, kv_bn2c, qw_t, qb2, pw_t, pb2)
    return out[:, :N] if Np != N else out


# ---------------------------------------------------------------------------
# Full module forward (eval mode: dropouts are identity)
# ---------------------------------------------------------------------------
def mit_attention_forward(x, H, W, params, *, num_heads, sr_ratio=1, matmul_dtype=None):
    """matmul_dtype: optional (e.g. 'bfloat16') dtype for MXU operands / intermediate
    activations; accumulation, softmax and LayerNorm stay in f32."""
    B, N, C = x.shape
    hd = C // num_heads
    scale = hd ** (-0.5)
    in_dtype = x.dtype
    cdt = jnp.dtype(matmul_dtype) if matmul_dtype is not None else in_dtype

    xc = x.astype(cdt)                                     # cast once at the boundary

    # K/V source (optional spatial reduction: strided conv == patchify + matmul,
    # with the LayerNorm fused into the matmul epilogue)
    if sr_ratio > 1:
        assert H % sr_ratio == 0 and W % sr_ratio == 0, \
            "patchified sr path requires H and W divisible by sr_ratio"
        Hr, Wr = H // sr_ratio, W // sr_ratio
        # (B, H*W, C) -> (B, Hr, sr, Wr, sr, C) -> (B*Hr*Wr, sr*sr*C) patches
        patches = xc.reshape(B, Hr, sr_ratio, Wr, sr_ratio, C)
        patches = patches.transpose(0, 1, 3, 2, 4, 5).reshape(
            B * Hr * Wr, sr_ratio * sr_ratio * C)
        # conv weight (C_out, C_in, kh, kw) -> (C_out, kh*kw*C_in) matching patch layout
        sr_w = jnp.asarray(params['sr_w']).transpose(0, 2, 3, 1).reshape(
            C, sr_ratio * sr_ratio * C)
        x_kv = linear(patches, sr_w, params['sr_b'],
                      ln_params=(params['norm_w'], params['norm_b'], 1e-5),
                      out_dtype=cdt)                       # fused conv-bias + LayerNorm
        Nkv = Hr * Wr
    else:
        x_kv = xc.reshape(B * N, C)
        Nkv = N

    kv = linear(x_kv, params['kv_w'], params.get('kv_b'), out_dtype=cdt)   # (B*Nkv, 2C)
    kv = kv.reshape(B, Nkv, 2 * C)

    # Q projection, per-head softmax attention and output projection fused in one kernel
    out = attention_proj(xc, kv, params['q_w'], params.get('q_b'),
                         params['proj_w'], params['proj_b'],
                         num_heads=num_heads, scale=scale, out_dtype=in_dtype)
    # TODO(synk): attn_drop / proj_drop are identity (p=0.0 / eval mode), so omitted.
    return out


# ---------------------------------------------------------------------------
# Plain-JAX reference (mirrors the PyTorch forward) for correctness check
# ---------------------------------------------------------------------------
def _ref_attention(x, H, W, p, *, num_heads, sr_ratio=1):
    B, N, C = x.shape
    hd = C // num_heads
    scale = hd ** (-0.5)

    def lin(t, w, b):
        y = t @ w.T
        return y + b if b is not None else y

    q = lin(x, p['q_w'], p.get('q_b')).reshape(B, N, num_heads, hd).transpose(0, 2, 1, 3)
    if sr_ratio > 1:
        x_img = x.transpose(0, 2, 1).reshape(B, C, H, W)
        x_sr = lax.conv_general_dilated(
            x_img, p['sr_w'], window_strides=(sr_ratio, sr_ratio), padding='VALID',
            dimension_numbers=('NCHW', 'OIHW', 'NCHW'))
        x_sr = x_sr + p['sr_b'][None, :, None, None]
        x_ = x_sr.reshape(B, C, -1).transpose(0, 2, 1)
        mu = x_.mean(-1, keepdims=True)
        var = ((x_ - mu) ** 2).mean(-1, keepdims=True)
        x_ = (x_ - mu) / jnp.sqrt(var + 1e-5) * p['norm_w'] + p['norm_b']
    else:
        x_ = x
    kv = lin(x_, p['kv_w'], p.get('kv_b'))
    Nkv = kv.shape[1]
    kv = kv.reshape(B, Nkv, 2, num_heads, hd).transpose(2, 0, 3, 1, 4)
    k, v = kv[0], kv[1]
    attn = (q @ jnp.swapaxes(k, -2, -1)) * scale
    attn = jax.nn.softmax(attn, axis=-1)
    out = (attn @ v).transpose(0, 2, 1, 3).reshape(B, N, C)
    return lin(out, p['proj_w'], p['proj_b'])


if __name__ == "__main__":
    key = jax.random.PRNGKey(0)
    B, H, W = 2, 8, 8
    C, num_heads, sr_ratio = 32, 4, 2          # head_dim = 8
    N = H * W

    keys = jax.random.split(key, 8)
    std = 0.05
    params = {
        'q_w':    std * jax.random.normal(keys[0], (C, C), jnp.float32),
        'kv_w':   std * jax.random.normal(keys[1], (2 * C, C), jnp.float32),
        'proj_w': std * jax.random.normal(keys[2], (C, C), jnp.float32),
        'proj_b': 0.01 * jax.random.normal(keys[3], (C,), jnp.float32),
        'sr_w':   std * jax.random.normal(keys[4], (C, C, sr_ratio, sr_ratio), jnp.float32),
        'sr_b':   0.01 * jax.random.normal(keys[5], (C,), jnp.float32),
        'norm_w': jnp.ones((C,), jnp.float32) + 0.01 * jnp.arange(C, dtype=jnp.float32),
        'norm_b': 0.001 * jnp.arange(C, dtype=jnp.float32),
        # qkv_bias=False (module default): no 'q_b' / 'kv_b'
    }
    x = jax.random.normal(keys[6], (B, N, C), jnp.float32)

    # --- f32 path, sr_ratio > 1 (spatial reduction + fused LayerNorm) ---------
    y = jax.block_until_ready(
        mit_attention_forward(x, H, W, params, num_heads=num_heads, sr_ratio=sr_ratio))
    y_ref = _ref_attention(x, H, W, params, num_heads=num_heads, sr_ratio=sr_ratio)
    assert y.shape == (B, N, C)
    # tolerance 3e-3: f32 matmuls + EUP approx-reciprocal softmax normalisation
    assert jnp.allclose(y, y_ref, atol=3e-3, rtol=3e-3), float(jnp.max(jnp.abs(y - y_ref)))

    # --- f32 path, sr_ratio == 1 (no spatial reduction) -----------------------
    y1 = jax.block_until_ready(
        mit_attention_forward(x, H, W, params, num_heads=num_heads, sr_ratio=1))
    y1_ref = _ref_attention(x, H, W, params, num_heads=num_heads, sr_ratio=1)
    assert jnp.allclose(y1, y1_ref, atol=3e-3, rtol=3e-3), float(jnp.max(jnp.abs(y1 - y1_ref)))

    # --- bf16 MXU operands (f32 accumulation / softmax / LN), sr_ratio > 1 ----
    yb = jax.block_until_ready(
        mit_attention_forward(x, H, W, params, num_heads=num_heads, sr_ratio=sr_ratio,
                              matmul_dtype='bfloat16'))
    assert jnp.allclose(yb.astype(jnp.float32), y_ref, atol=5e-2, rtol=5e-2), \
        float(jnp.max(jnp.abs(yb.astype(jnp.float32) - y_ref)))

    print("KERNEL_OK")
</pallas_src>

<mosaic_0001>
module attributes {stable_mosaic.version = 11 : i64} {
  func.func @_linear_ln_kernel(%arg0: i32, %arg1: memref<32x128xf32, #tpu.memory_space<vmem>>, %arg2: memref<128x32xf32, #tpu.memory_space<vmem>>, %arg3: memref<1x32xf32, #tpu.memory_space<vmem>>, %arg4: memref<1x32xf32, #tpu.memory_space<vmem>>, %arg5: memref<1x32xf32, #tpu.memory_space<vmem>>, %arg6: memref<32x32xf32, #tpu.memory_space<vmem>>) attributes {dimension_semantics = [#tpu.dimension_semantics<parallel>], iteration_bounds = array<i64: 1>, scalar_prefetch = 0 : i64, scratch_operands = 0 : i64, tpu.core_type = #tpu.core_type<tc>, window_params = [{transform_indices = @transform_0, window_bounds = array<i64: 32, 128>}, {pipeline_mode = #tpu.pipeline_mode<synchronous>, transform_indices = @transform_1, window_bounds = array<i64: 128, 32>}, {pipeline_mode = #tpu.pipeline_mode<synchronous>, transform_indices = @transform_2, window_bounds = array<i64: 1, 32>}, {pipeline_mode = #tpu.pipeline_mode<synchronous>, transform_indices = @transform_3, window_bounds = array<i64: 1, 32>}, {pipeline_mode = #tpu.pipeline_mode<synchronous>, transform_indices = @transform_4, window_bounds = array<i64: 1, 32>}, {transform_indices = @transform_5, window_bounds = array<i64: 32, 32>}]} {
    %c0 = arith.constant 0 : index
    %c0_0 = arith.constant 0 : index
    %0 = vector.load %arg1[%c0, %c0_0] : memref<32x128xf32, #tpu.memory_space<vmem>>, vector<32x128xf32>
    %c0_1 = arith.constant 0 : index
    %c0_2 = arith.constant 0 : index
    %1 = vector.load %arg2[%c0_1, %c0_2] : memref<128x32xf32, #tpu.memory_space<vmem>>, vector<128x32xf32>
    %cst = arith.constant dense<0.000000e+00> : vector<32x32xf32>
    %2 = tpu.matmul %0, %1, %cst {dimension_numbers = #tpu.dot_dimension_numbers<[1], [0], [0], [1], [0, 0, 1, 1], [], []>} : vector<32x128xf32>, vector<128x32xf32>, vector<32x32xf32> -> vector<32x32xf32>
    %c0_3 = arith.constant 0 : index
    %c0_4 = arith.constant 0 : index
    %3 = vector.load %arg3[%c0_3, %c0_4] : memref<1x32xf32, #tpu.memory_space<vmem>>, vector<1x32xf32>
    %4 = vector.broadcast %3 : vector<1x32xf32> to vector<32x32xf32>
    %5 = arith.addf %2, %4 : vector<32x32xf32>
    %cst_5 = arith.constant dense<0.000000e+00> : vector<32xf32>
    %6 = vector.multi_reduction <add>, %5, %cst_5 [1] : vector<32x32xf32> to vector<32xf32>
    %7 = vector.shape_cast %6 : vector<32xf32> to vector<32x1xf32>
    %cst_6 = arith.constant 3.200000e+01 : f32
    %8 = vector.broadcast %cst_6 : f32 to vector<32x1xf32>
    %9 = arith.divf %7, %8 : vector<32x1xf32>
    %10 = arith.mulf %5, %5 : vector<32x32xf32>
    %cst_7 = arith.constant dense<0.000000e+00> : vector<32xf32>
    %11 = vector.multi_reduction <add>, %10, %cst_7 [1] : vector<32x32xf32> to vector<32xf32>
    %12 = vector.shape_cast %11 : vector<32xf32> to vector<32x1xf32>
    %cst_8 = arith.constant 3.200000e+01 : f32
    %13 = vector.broadcast %cst_8 : f32 to vector<32x1xf32>
    %14 = arith.divf %12, %13 : vector<32x1xf32>
    %15 = arith.mulf %9, %9 : vector<32x1xf32>
    %16 = arith.subf %14, %15 : vector<32x1xf32>
    %cst_9 = arith.constant 0.000000e+00 : f32
    %17 = vector.broadcast %cst_9 : f32 to vector<32x1xf32>
    %18 = arith.maximumf %16, %17 : vector<32x1xf32>
    %cst_10 = arith.constant 9.99999974E-6 : f32
    %19 = vector.broadcast %cst_10 : f32 to vector<32x1xf32>
    %20 = arith.addf %18, %19 : vector<32x1xf32>
    %21 = math.rsqrt %20 : vector<32x1xf32>
    %22 = vector.broadcast %9 : vector<32x1xf32> to vector<32x32xf32>
    %23 = arith.subf %5, %22 : vector<32x32xf32>
    %24 = vector.broadcast %21 : vector<32x1xf32> to vector<32x32xf32>
    %25 = arith.mulf %23, %24 : vector<32x32xf32>
    %c0_11 = arith.constant 0 : index
    %c0_12 = arith.constant 0 : index
    %26 = vector.load %arg4[%c0_11, %c0_12] : memref<1x32xf32, #tpu.memory_space<vmem>>, vector<1x32xf32>
    %27 = vector.broadcast %26 : vector<1x32xf32> to vector<32x32xf32>
    %28 = arith.mulf %25, %27 : vector<32x32xf32>
    %c0_13 = arith.constant 0 : index
    %c0_14 = arith.constant 0 : index
    %29 = vector.load %arg5[%c0_13, %c0_14] : memref<1x32xf32, #tpu.memory_space<vmem>>, vector<1x32xf32>
    %30 = vector.broadcast %29 : vector<1x32xf32> to vector<32x32xf32>
    %31 = arith.addf %28, %30 : vector<32x32xf32>
    %c0_15 = arith.constant 0 : index
    %c0_16 = arith.constant 0 : index
    %32 = vector.load %arg6[%c0_15, %c0_16] : memref<32x32xf32, #tpu.memory_space<vmem>>, vector<32x32xf32>
    tpu.vector_store %arg6[%c0_15, %c0_16], %31 {strides = array<i32>} : memref<32x32xf32, #tpu.memory_space<vmem>>, vector<32x32xf32>,
    return
  }
  func.func @transform_0(%arg0: i32) -> (i32, i32) {
    %c0_i32 = arith.constant 0 : i32
    %c0_i32_0 = arith.constant 0 : i32
    return %arg0, %c0_i32 : i32, i32
  }
  func.func @transform_1(%arg0: i32) -> (i32, i32) {
    %c0_i32 = arith.constant 0 : i32
    %c0_i32_0 = arith.constant 0 : i32
    %c0_i32_1 = arith.constant 0 : i32
    return %c0_i32, %c0_i32_0 : i32, i32
  }
  func.func @transform_2(%arg0: i32) -> (i32, i32) {
    %c0_i32 = arith.constant 0 : i32
    %c0_i32_0 = arith.constant 0 : i32
    %c0_i32_1 = arith.constant 0 : i32
    return %c0_i32, %c0_i32_0 : i32, i32
  }
  func.func @transform_3(%arg0: i32) -> (i32, i32) {
    %c0_i32 = arith.constant 0 : i32
    %c0_i32_0 = arith.constant 0 : i32
    %c0_i32_1 = arith.constant 0 : i32
    return %c0_i32, %c0_i32_0 : i32, i32
  }
  func.func @transform_4(%arg0: i32) -> (i32, i32) {
    %c0_i32 = arith.constant 0 : i32
    %c0_i32_0 = arith.constant 0 : i32
    %c0_i32_1 = arith.constant 0 : i32
    return %c0_i32, %c0_i32_0 : i32, i32
  }
  func.func @transform_5(%arg0: i32) -> (i32, i32) {
    %c0_i32 = arith.constant 0 : i32
    %c0_i32_0 = arith.constant 0 : i32
    return %arg0, %c0_i32 : i32, i32
  }
}

</mosaic_0001>

<bundles_post_ra>
// kernel: tpu_custom_call.1
= control target key start
LH: loop header
LB: loop body
LE: loop exit
PB: predicated region body
PF: predicated region fallthrough
CT: control target
= control target key end

     0   :  { %s508_s0 = inlined_call_operand.vmem [shape: f32[32,128], index: 0, kind: input, shape index: {}]   ;;  %s509_s1 = inlined_call_operand.vmem [shape: f32[128,32], index: 1, kind: input, shape index: {}]   ;;  %s510_s2 = inlined_call_operand.vmem [shape: f32[1,32], index: 2, kind: input, shape index: {}]   ;;  %s511_s3 = inlined_call_operand.vmem [shape: f32[1,32], index: 3, kind: input, shape index: {}]   ;;  %s512_s4 = inlined_call_operand.vmem [shape: f32[1,32], index: 4, kind: input, shape index: {}]   ;;  %s513_s5 = inlined_call_operand.hbm [shape: f32[32,32], index: 5, kind: output, shape index: {}]  }
   0x1   :  { %v40_v0 = vld [vmem:[%s509_s1 + $0x78] sm:$0xff]  ;;  %v39_v1 = vld [vmem:[%s509_s1 + $0x70] sm:$0xff]  ;;  %v38_v2 = vld [vmem:[%s509_s1 + $0x68] sm:$0xff] }
   0x2   :  { %264 = vmatprep.subr.mxu0 %v40_v0  ;;  %302 = vmatprep.subr.mxu1 %v40_v0  ;;  %v37_v3 = vld [vmem:[%s509_s1 + $0x60] sm:$0xff]  ;;  %v36_v4 = vld [vmem:[%s509_s1 + $0x58] sm:$0xff] }
   0x3   :  { %265 = vmatpush3.msra.mxu0 %v40_v0  ;;  %318 = vmatpush3.msra.mxu1 %v40_v0 }
   0x4   :  { %266 = vmatprep.subr.mxu0 %v39_v1  ;;  %303 = vmatprep.subr.mxu1 %v39_v1 }
   0x5   :  { %267 = vmatpush3.msra.mxu0 %v39_v1  ;;  %319 = vmatpush3.msra.mxu1 %v39_v1 }
   0x6   :  { %268 = vmatprep.subr.mxu0 %v38_v2  ;;  %304 = vmatprep.subr.mxu1 %v38_v2 }
   0x7   :  { %269 = vmatpush3.msra.mxu0 %v38_v2  ;;  %320 = vmatpush3.msra.mxu1 %v38_v2 }
   0x8   :  { %10 = vsyncpa [#allocation3], 0  ;;  %270 = vmatprep.subr.mxu0 %v37_v3  ;;  %305 = vmatprep.subr.mxu1 %v37_v3  ;;  %v35_v5 = vld [vmem:[%s509_s1 + $0x50] sm:$0xff]  ;;  %v34_v6 = vld [vmem:[%s509_s1 + $0x48] sm:$0xff]  ;;  %vm133_vm0 = vcmask 261120  }
   0x9   :  { %271 = vmatpush3.msra.mxu0 %v37_v3  ;;  %321 = vmatpush3.msra.mxu1 %v37_v3  ;;  %v33_v7 = vld [vmem:[%s509_s1 + $0x40] sm:$0xff]  ;;  %v32_v8 = vld [vmem:[%s509_s1 + $0x38] sm:$0xff]  ;;  %v31_v9 = vld [vmem:[%s509_s1 + $0x30] sm:$0xff] }
   0xa   :  { %272 = vmatprep.subr.mxu0 %v36_v4  ;;  %306 = vmatprep.subr.mxu1 %v36_v4  ;;  %v30_v10 = vld [vmem:[%s509_s1 + $0x28] sm:$0xff]  ;;  %v29_v11 = vld [vmem:[%s509_s1 + $0x20] sm:$0xff]  ;;  %v28_v12 = vld [vmem:[%s509_s1 + $0x18] sm:$0xff] }
   0xb   :  { %273 = vmatpush3.msra.mxu0 %v36_v4  ;;  %322 = vmatpush3.msra.mxu1 %v36_v4  ;;  %v27_v13 = vld [vmem:[%s509_s1 + $0x10] sm:$0xff]  ;;  %v26_v14 = vld [vmem:[%s509_s1 + $0x8] sm:$0xff]  ;;  %v25_v15 = vld [vmem:[%s509_s1] sm:$0xff] }
   0xc   :  { %274 = vmatprep.subr.mxu0 %v35_v5  ;;  %307 = vmatprep.subr.mxu1 %v35_v5  ;;  %v21_v16 = vld [vmem:[%s508_s0] sm:$0xff]  ;;  %v23_v17 = vld [vmem:[%s508_s0 + $0x10] sm:$0xff]  ;;  %v22_v18 = vld [vmem:[%s508_s0 + $0x8] sm:$0xff] }
   0xd   :  { %275 = vmatpush3.msra.mxu0 %v35_v5  ;;  %323 = vmatpush3.msra.mxu1 %v35_v5  ;;  %v24_v19 = vld [vmem:[%s508_s0 + $0x18] sm:$0xff]  ;;  %v241_v20 = vld [vmem:[%s510_s2] ss:$0 sm:$0xff] }
   0xe   :  { %276 = vmatprep.subr.mxu0 %v34_v6  ;;  %308 = vmatprep.subr.mxu1 %v34_v6 }
   0xf   :  { %277 = vmatpush3.msra.mxu0 %v34_v6  ;;  %324 = vmatpush3.msra.mxu1 %v34_v6 }
  0x10   :  { %278 = vmatprep.subr.mxu0 %v33_v7  ;;  %309 = vmatprep.subr.mxu1 %v33_v7 }
  0x11   :  { %279 = vmatpush3.msra.mxu0 %v33_v7  ;;  %325 = vmatpush3.msra.mxu1 %v33_v7 }
  0x12   :  { %280 = vmatprep.subr.mxu0 %v32_v8  ;;  %310 = vmatprep.subr.mxu1 %v32_v8 }
  0x13   :  { %281 = vmatpush3.msra.mxu0 %v32_v8  ;;  %326 = vmatpush3.msra.mxu1 %v32_v8 }
  0x14   :  { %282 = vmatprep.subr.mxu0 %v31_v9  ;;  %311 = vmatprep.subr.mxu1 %v31_v9 }
  0x15   :  { %283 = vmatpush3.msra.mxu0 %v31_v9  ;;  %327 = vmatpush3.msra.mxu1 %v31_v9 }
  0x16   :  { %284 = vmatprep.subr.mxu0 %v30_v10  ;;  %312 = vmatprep.subr.mxu1 %v30_v10 }
  0x17   :  { %285 = vmatpush3.msra.mxu0 %v30_v10  ;;  %328 = vmatpush3.msra.mxu1 %v30_v10 }
  0x18   :  { %286 = vmatprep.subr.mxu0 %v29_v11  ;;  %313 = vmatprep.subr.mxu1 %v29_v11 }
  0x19   :  { %287 = vmatpush3.msra.mxu0 %v29_v11  ;;  %329 = vmatpush3.msra.mxu1 %v29_v11 }
  0x1a   :  { %288 = vmatprep.subr.mxu0 %v28_v12  ;;  %314 = vmatprep.subr.mxu1 %v28_v12 }
  0x1b   :  { %289 = vmatpush3.msra.mxu0 %v28_v12  ;;  %330 = vmatpush3.msra.mxu1 %v28_v12  ;;  %v242_v12 = vld [vmem:[%s511_s3] ss:$0 sm:$0xff]  ;;  %s367_s3 = smov [#allocation2]  }
  0x1c   :  { %290 = vmatprep.subr.mxu0 %v27_v13  ;;  %315 = vmatprep.subr.mxu1 %v27_v13  ;;  %s230_s11 = sshll.u32 %s367_s3, 4  ;;  %s231_s11 = int_to_ptr.vmem [resolvable:$true] %s230_s11 }
  0x1d   :  { %291 = vmatpush3.msra.mxu0 %v27_v13  ;;  %331 = vmatpush3.msra.mxu1 %v27_v13  ;;  %p350_p1 = scmp.lt.s32.totalorder %s231_s11, %s231_s11 }
  0x1e   :  { %292 = vmatprep.subr.mxu0 %v26_v14  ;;  %316 = vmatprep.subr.mxu1 %v26_v14 }
  0x1f   :  { %293 = vmatpush3.msra.mxu0 %v26_v14  ;;  %332 = vmatpush3.msra.mxu1 %v26_v14 }
  0x20   :  { %294 = vmatprep.subr.mxu0 %v25_v15  ;;  %317 = vmatprep.subr.mxu1 %v25_v15 }
  0x21   :  { %295 = vmatpush3.msra.mxu0 %v25_v15  ;;  %333 = vmatpush3.msra.mxu1 %v25_v15 }
  0x22   :  { %296 = vmatprep.mubr.f32.mxu0 %v21_v16  ;;  %299 = vmatprep.mubr.f32.mxu1 %v23_v17  ;;  %v243_v16 = vld [vmem:[%s512_s4] ss:$0 sm:$0xff]  ;;  %s345_s4 = scalar_lea.vmem %s231_s11, 512 }
  0x23   :  { %297 = vmatmul.mubr.f32.vlgmr.msra.gmra.mxu0 %v22_v18  ;;  %300 = vmatmul.mubr.f32.vlgmr.msra.gmra.mxu1 %v24_v19  ;;  %p346_p0 = scmp.ne.s32.totalorder %s231_s11, %s345_s4  ;;  %p351_p2 = scmp.lt.s32.totalorder %s345_s4, %s345_s4 }
  0x25   :  { %p352_p3 = por %p351_p2, %p350_p1 }
  0x27   :  { %p353_p4 = pnand %p352_p3, %p346_p0 }
  0xe3   :  { %v298_v21 = vpop.f32.mrf.mxu0  ;;  %v301_v22 = vpop.f32.mrf.mxu1 }
  0xe4   :  { %v463_v23 = vadd.f32 %v298_v21, %v241_v20  ;;  %v465_v24 = vadd.f32 %v301_v22, %v241_v20 }
  0xe5   :  { %v114_v25 = vpop.f32.mrf.mxu0  ;;  %v124_v26 = vpop.f32.mrf.mxu1 }
  0xe6   :  { %v467_v27 = vadd.f32 %v241_v20, %v114_v25  ;;  %v469_v28 = vadd.f32 %v241_v20, %v124_v26  ;;  %v143_v29 = vsel %vm133_vm0, %v465_v24, 0.0  ;;  %v137_v30 = vsel %vm133_vm0, %v463_v23, 0.0 }
  0xe7   :  { %144 = vadd.xlane.f32.xlu1 %v143_v29  ;;  %138 = vadd.xlane.f32.xlu0 %v137_v30  ;;  %v152_v33 = vmul.f32 %v463_v23, %v463_v23  ;;  %v154_v37 = vmul.f32 %v465_v24, %v465_v24 }
  0xe8   :  { %v140_v31 = vsel %vm133_vm0, %v469_v28, 0.0  ;;  %v134_v32 = vsel %vm133_vm0, %v467_v27, 0.0  ;;  %v151_v34 = vmul.f32 %v467_v27, %v467_v27  ;;  %v153_v38 = vmul.f32 %v469_v28, %v469_v28 }
  0xe9   :  { %v158_v35 = vsel %vm133_vm0, %v152_v33, 0.0  ;;  %v164_v39 = vsel %vm133_vm0, %v154_v37, 0.0 }
  0xea   :  { %v155_v36 = vsel %vm133_vm0, %v151_v34, 0.0  ;;  %v161_v40 = vsel %vm133_vm0, %v153_v38, 0.0 }
  0xeb   :  { %141 = vadd.xlane.f32.xlu1 %v140_v31  ;;  %135 = vadd.xlane.f32.xlu0 %v134_v32 }
  0xef   :  { %159 = vadd.xlane.f32.xlu1 %v158_v35  ;;  %156 = vadd.xlane.f32.xlu0 %v155_v36 }
  0xf3   :  { %165 = vadd.xlane.f32.xlu1 %v164_v39  ;;  %162 = vadd.xlane.f32.xlu0 %v161_v40 }
 0x170   :  { %v145_v41 = vpop.xlane.xlu1 %144  ;;  %v139_v42 = vpop.xlane.xlu0 %138 }
 0x171   :  { %v148_v45 = vmul.f32 0.03125, %v139_v42  ;;  %v150_v47 = vmul.f32 0.03125, %v145_v41 }
 0x173   :  { %v172_v51 = vmul.f32 %v148_v45, %v148_v45  ;;  %v174_v57 = vmul.f32 %v150_v47, %v150_v47  ;;  %v192_v9 = vsub.f32 %v463_v23, %v148_v45  ;;  %v194_v17 = vsub.f32 %v465_v24, %v150_v47 }
 0x174   :  { %v142_v43 = vpop.xlane.xlu1 %141  ;;  %v136_v44 = vpop.xlane.xlu0 %135 }
 0x175   :  { %v147_v46 = vmul.f32 0.03125, %v136_v44  ;;  %v149_v48 = vmul.f32 0.03125, %v142_v43 }
 0x177   :  { %v171_v52 = vmul.f32 %v147_v46, %v147_v46  ;;  %v173_v58 = vmul.f32 %v149_v48, %v149_v48  ;;  %v191_v11 = vsub.f32 %v467_v27, %v147_v46  ;;  %v193_v20 = vsub.f32 %v469_v28, %v149_v48 }
 0x178   :  { %v160_v49 = vpop.xlane.xlu1 %159  ;;  %v157_v50 = vpop.xlane.xlu0 %156 }
 0x179   :  { %v168_v53 = vmul.f32 0.03125, %v160_v49  ;;  %v167_v54 = vmul.f32 0.03125, %v157_v50 }
 0x17b   :  { %v176_v55 = vsub.f32 %v168_v53, %v172_v51  ;;  %v175_v56 = vsub.f32 %v167_v54, %v171_v52 }
 0x17c   :  { %v166_v59 = vpop.xlane.xlu1 %165  ;;  %v163_v60 = vpop.xlane.xlu0 %162 }
 0x17d   :  { %v180_v61 = vmax.f32 %v176_v55, 0.0  ;;  %v179_v62 = vmax.f32 %v175_v56, 0.0  ;;  %v170_v63 = vmul.f32 0.03125, %v166_v59  ;;  %v169_v0 = vmul.f32 0.03125, %v163_v60 }
 0x17f   :  { %v184_v1 = vadd.f32 1e-05, %v180_v61  ;;  %v183_v2 = vadd.f32 1e-05, %v179_v62  ;;  %v178_v3 = vsub.f32 %v170_v63, %v174_v57  ;;  %v177_v4 = vsub.f32 %v169_v0, %v173_v58 }
 0x181   :  { %337 = vrsqrt.f32 %v184_v1  ;;  %v182_v5 = vmax.f32 %v178_v3, 0.0  ;;  %v181_v6 = vmax.f32 %v177_v4, 0.0 }
 0x182   :  { %339 = vrsqrt.f32 %v183_v2 }
 0x183   :  { %v186_v7 = vadd.f32 1e-05, %v182_v5  ;;  %v185_v8 = vadd.f32 1e-05, %v181_v6 }
 0x185   :  { %341 = vrsqrt.f32 %v186_v7 }
 0x186   :  { %343 = vrsqrt.f32 %v185_v8 }
 0x18e   :  { %v338_v10 = vpop.eup %337 }
 0x18f   :  { %v340_v13 = vpop.eup %339  ;;  %v196_v14 = vmul.f32 %v338_v10, %v192_v9 }
 0x190   :  { %v195_v15 = vmul.f32 %v340_v13, %v191_v11 }
 0x191   :  { %v207_v18 = vmul.f32 %v242_v12, %v196_v14 }
 0x192   :  { %v342_v19 = vpop.eup %341  ;;  %v206_v21 = vmul.f32 %v242_v12, %v195_v15 }
 0x193   :  { %v344_v22 = vpop.eup %343  ;;  %v198_v23 = vmul.f32 %v342_v19, %v194_v17  ;;  %v218_v25 = vadd.f32 %v243_v16, %v207_v18 }
 0x194   :  { %v197_v26 = vmul.f32 %v344_v22, %v193_v20  ;;  %v217_v27 = vadd.f32 %v243_v16, %v206_v21 }
 0x195   :  { %v209_v29 = vmul.f32 %v242_v12, %v198_v23  ;;  %222 = vst.msk [vmem:[#allocation2 + $0x8] sm:$0xff] %vm133_vm0, %v218_v25 }
 0x196   :  { %v208_v30 = vmul.f32 %v242_v12, %v197_v26  ;;  %221 = vst.msk [vmem:[#allocation2] sm:$0xff] %vm133_vm0, %v217_v27 }
 0x197   :  { %v220_v31 = vadd.f32 %v243_v16, %v209_v29 }
 0x198   :  { %v219_v24 = vadd.f32 %v243_v16, %v208_v30 }
 0x199   :  { %224 = vst.msk [vmem:[#allocation2 + $0x18] sm:$0xff] %vm133_vm0, %v220_v31 }
 0x19a   :  { %223 = vst.msk [vmem:[#allocation2 + $0x10] sm:$0xff] %vm133_vm0, %v219_v24 }
 0x19b   :  { %356 = shalt.err (!%p353_p4)
}
 0x19c   :  { %s368_s12 = smov 128   ;;  %s369_s13 = smov 8  }
 0x19d   :  { %236 = dma.vmem_to_hbm [thread:$0]  %s231_s11, 512, %s513_s5, [#allocation3], %s368_s12, %s368_s12, %s369_s13  }
 0x19e   :  { %365 = dma.done.wait [#allocation3], 512  }
 0x19f   :  { %366 = vsyncadd [#allocation3], 4294966784 }
 0x1a0   :  { %240 = vsyncpa [#allocation3], 1 }

</bundles_post_ra>
